<compile_context>
chip_gen: v7x
topology: tpu7x:2x2x1
jax: 0.10.0
libtpu: 0.0.40
codegen_flags: <defaults>
</compile_context>

<pallas_src>
import jax
import jax.numpy as jnp
from jax import lax
from jax.experimental import pallas as pl
from jax.experimental.pallas import tpu as pltpu


_INV_SQRT2 = 0.7071067811865476  # 1/sqrt(2): constant multiply instead of a divide


def _gelu_exact(x):
    # nn.GELU() default = exact erf-based GELU (erf = VALU polynomial on TPU).
    return 0.5 * x * (1.0 + lax.erf(x * _INV_SQRT2))


def _round_up(v, m):
    return ((v + m - 1) // m) * m


def fusion_kernel(x_ref, w_ref, bias_ref, o_ref):
    """One (batch, spatial-tile) step of fused concat + conv1x1 + BN + GELU.

    x_ref    : (1, C_x, S)    pixel channels for this batch / spatial tile
    w_ref    : (C_out, C_x)   BN-folded conv weight, x channel group (resident)
    bias_ref : (B, C_out, 1)  per-batch bias = conv(t,c) + conv bias + BN shift
                              (whole array resident; indexed by program_id(0))
    o_ref    : (1, C_out, S)  lane-dense output tile
    """
    x = x_ref[0]                                   # (C_x, S) in model dtype
    # 1x1 conv over the x channel group == matmul with spatial on lanes.
    # Small C_x under-fills the MXU, but the kernel is HBM-bound so the
    # matmul hides behind the DMA pipeline; f32 accumulation on the MXU.
    h = jnp.dot(w_ref[...], x, preferred_element_type=jnp.float32)  # (C_out, S)
    h = h + bias_ref[pl.program_id(0)]             # (C_out, 1) broadcast over lanes
    o_ref[0] = _gelu_exact(h).astype(o_ref.dtype)


def fusion_block_forward(x, t, c, conv_w, conv_b,
                         bn_gamma, bn_beta, bn_mean, bn_var,
                         eps=1e-5, spatial_tile_cap=1024,
                         vmem_tile_budget_bytes=24 << 20):
    """Fused FusionBlock forward (eval-mode BatchNorm with running stats).

    x: (B, C_x, H, W);  t: (B, C_t, 1, 1);  c: (B, C_c, 1, 1)
    conv_w: (C_out, C_x + C_t + C_c)   [PyTorch (C_out, C_in, 1, 1) squeezed]
    """
    b, c_x, hgt, wid = x.shape
    c_t = t.shape[1]
    c_c = c.shape[1]
    c_out = conv_w.shape[0]
    f32 = jnp.float32
    act_dtype = x.dtype
    itemsize = jnp.dtype(act_dtype).itemsize

    # ---- Fold BatchNorm (inference) into the conv:  y = scale*(W z + b - mu) + beta
    scale = bn_gamma.astype(f32) / jnp.sqrt(bn_var.astype(f32) + eps)        # (C_out,)
    w_fused = conv_w.astype(f32) * scale[:, None]                            # (C_out, C_in)
    b_fused = scale * (conv_b.astype(f32) - bn_mean.astype(f32)) + bn_beta.astype(f32)

    # ---- Split the folded weight along the channel-concat groups.
    w_x = w_fused[:, :c_x].astype(act_dtype)   # per-pixel part       (C_out, C_x)
    w_tc = w_fused[:, c_x:]                    # spatially-constant   (C_out, C_t+C_c)

    # ---- t / c are spatially constant -> conv contribution is per-batch only.
    tc = jnp.concatenate([t.reshape(b, c_t), c.reshape(b, c_c)], axis=1).astype(f32)
    batch_bias = jnp.einsum("bi,oi->bo", tc, w_tc,
                            precision=lax.Precision.HIGHEST) + b_fused       # (B, C_out)
    batch_bias = batch_bias.reshape(b, c_out, 1)                             # stays f32

    # ---- Spatial axis on lanes; no padding (Pallas masks the ragged tail block).
    hw = hgt * wid
    x3 = x.reshape(b, c_x, hw)

    # Tile selection: largest 128-multiple <= cap that fits the VMEM budget
    # (double-buffered in/out blocks + f32 epilogue temps), conservative enough
    # for v7x (64 MiB physical) and v5e (16 MiB scoped default gets raised below).
    def _tile_bytes(s):
        io = 2 * (c_x + c_out) * s * itemsize      # double-buffered input + output blocks
        tmp = 4 * c_out * s * 4                    # f32 matmul/bias/GELU temps
        return io + tmp

    s_tile = min(_round_up(spatial_tile_cap, 128), _round_up(hw, 128))
    while s_tile > 128 and _tile_bytes(s_tile) > vmem_tile_budget_bytes:
        s_tile -= 128
    # v7x has 2 TensorCores: make sure the parallel grid has >= 2 steps.
    while b * pl.cdiv(hw, s_tile) < 2 and s_tile > 128:
        s_tile = max(128, _round_up(s_tile // 2, 128))
    n_s = pl.cdiv(hw, s_tile)

    resident = 2 * c_out * c_x * itemsize + 2 * b * c_out * 128 * 4  # weight + lane-padded bias
    est = _tile_bytes(s_tile) + resident
    vmem_limit = int(min(48 << 20, max(32 << 20, 4 * est)))

    cost = pl.CostEstimate(
        flops=2 * b * c_out * c_x * hw,
        transcendentals=b * c_out * hw,
        bytes_accessed=(c_x + c_out) * hw * b * itemsize + c_out * c_x * itemsize,
    )

    out = pl.pallas_call(
        fusion_kernel,
        out_shape=jax.ShapeDtypeStruct((b, c_out, hw), act_dtype),
        grid_spec=pltpu.PrefetchScalarGridSpec(
            num_scalar_prefetch=0,
            grid=(b, n_s),
            in_specs=[
                pl.BlockSpec((1, c_x, s_tile), lambda bi, si: (bi, 0, si)),
                pl.BlockSpec((c_out, c_x), lambda bi, si: (0, 0)),     # resident weight
                pl.BlockSpec((b, c_out, 1), lambda bi, si: (0, 0, 0)),  # resident bias
            ],
            out_specs=pl.BlockSpec((1, c_out, s_tile), lambda bi, si: (bi, 0, si)),
        ),
        compiler_params=pltpu.CompilerParams(
            dimension_semantics=("parallel", "parallel"),
            vmem_limit_bytes=vmem_limit),
        cost_estimate=cost,
    )(x3, w_x, batch_bias)

    return out.reshape(b, c_out, hgt, wid)


def _reference(x, t, c, conv_w, conv_b, bn_gamma, bn_beta, bn_mean, bn_var, eps):
    # Pure-JAX reference with exact module semantics: concat -> conv1x1 -> BN -> GELU.
    bsz, c_t = t.shape[0], t.shape[1]
    c_c = c.shape[1]
    hgt, wid = x.shape[-2:]
    cat = jnp.concatenate(
        [x,
         jnp.broadcast_to(t, (bsz, c_t, hgt, wid)),
         jnp.broadcast_to(c, (bsz, c_c, hgt, wid))], axis=1)
    conv = (jnp.einsum("oi,bihw->bohw", conv_w, cat, precision=lax.Precision.HIGHEST)
            + conv_b[None, :, None, None])
    bn = ((conv - bn_mean[None, :, None, None])
          / jnp.sqrt(bn_var[None, :, None, None] + eps)
          * bn_gamma[None, :, None, None]
          + bn_beta[None, :, None, None])
    return jax.nn.gelu(bn, approximate=False)


if __name__ == "__main__":
    B, Cx, H, W = 2, 4, 16, 16
    Ct, Cc, Cout = 8, 8, 32
    Cin = Cx + Ct + Cc
    eps = 1e-5

    key = jax.random.PRNGKey(0)
    kx, kt, kc, kw, kb, kg, kbe, km, kv = jax.random.split(key, 9)

    x = jax.random.normal(kx, (B, Cx, H, W), dtype=jnp.float32)
    t = jax.random.normal(kt, (B, Ct, 1, 1), dtype=jnp.float32)
    c = jax.random.normal(kc, (B, Cc, 1, 1), dtype=jnp.float32)

    # nn.Conv2d default init: uniform(-1/sqrt(fan_in), 1/sqrt(fan_in)), fan_in = Cin.
    lim = 1.0 / (Cin ** 0.5)
    conv_w = jax.random.uniform(kw, (Cout, Cin), jnp.float32, -lim, lim)
    conv_b = jax.random.uniform(kb, (Cout,), jnp.float32, -lim, lim)

    # Non-trivial BatchNorm parameters / running stats (eval-mode semantics).
    bn_gamma = jax.random.uniform(kg, (Cout,), jnp.float32, 0.5, 1.5)
    bn_beta = 0.1 * jax.random.normal(kbe, (Cout,), jnp.float32)
    bn_mean = 0.1 * jax.random.normal(km, (Cout,), jnp.float32)
    bn_var = jax.random.uniform(kv, (Cout,), jnp.float32, 0.5, 1.5)

    # ---- Main check: H*W divisible by the tile (grid (2, 1), 2 parallel steps).
    out = fusion_block_forward(x, t, c, conv_w, conv_b,
                               bn_gamma, bn_beta, bn_mean, bn_var, eps=eps)
    out = jax.block_until_ready(out)
    assert out.shape == (B, Cout, H, W)
    ref = _reference(x, t, c, conv_w, conv_b, bn_gamma, bn_beta, bn_mean, bn_var, eps)
    err = float(jnp.max(jnp.abs(out - ref)))
    assert jnp.allclose(out, ref, atol=3e-5, rtol=3e-5), "max abs err = %g" % err

    # ---- Ragged check: H*W not a multiple of the spatial tile (no pad / no slice;
    #      Pallas masks the tail block).
    H2, W2 = 12, 16                      # hw = 192 = 128 + 64 with a 128 tile
    x2 = jax.random.normal(kx, (B, Cx, H2, W2), dtype=jnp.float32)
    out2 = fusion_block_forward(x2, t, c, conv_w, conv_b,
                                bn_gamma, bn_beta, bn_mean, bn_var,
                                eps=eps, spatial_tile_cap=128)
    out2 = jax.block_until_ready(out2)
    ref2 = _reference(x2, t, c, conv_w, conv_b, bn_gamma, bn_beta, bn_mean, bn_var, eps)
    err2 = float(jnp.max(jnp.abs(out2 - ref2)))
    assert jnp.allclose(out2, ref2, atol=3e-5, rtol=3e-5), "max abs err = %g" % err2

    print("KERNEL_OK")
</pallas_src>

<mosaic_0001>
module attributes {stable_mosaic.version = 11 : i64} {
  func.func @fusion_kernel(%arg0: i32, %arg1: i32, %arg2: memref<1x4x256xf32, #tpu.memory_space<vmem>>, %arg3: memref<32x4xf32, #tpu.memory_space<vmem>>, %arg4: memref<2x32x1xf32, #tpu.memory_space<vmem>>, %arg5: memref<1x32x256xf32, #tpu.memory_space<vmem>>) attributes {dimension_semantics = [#tpu.dimension_semantics<parallel>, #tpu.dimension_semantics<parallel>], iteration_bounds = array<i64: 2, 1>, scalar_prefetch = 0 : i64, scratch_operands = 0 : i64, tpu.core_type = #tpu.core_type<tc>, window_params = [{transform_indices = @transform_0, window_bounds = array<i64: 1, 4, 256>}, {pipeline_mode = #tpu.pipeline_mode<synchronous>, transform_indices = @transform_1, window_bounds = array<i64: 32, 4>}, {pipeline_mode = #tpu.pipeline_mode<synchronous>, transform_indices = @transform_2, window_bounds = array<i64: 2, 32, 1>}, {transform_indices = @transform_3, window_bounds = array<i64: 1, 32, 256>}]} {
    %c0 = arith.constant 0 : index
    %c0_0 = arith.constant 0 : index
    %c0_1 = arith.constant 0 : index
    %0 = vector.load %arg2[%c0, %c0_0, %c0_1] : memref<1x4x256xf32, #tpu.memory_space<vmem>>, vector<1x4x256xf32>
    %1 = vector.shape_cast %0 : vector<1x4x256xf32> to vector<4x256xf32>
    %c0_2 = arith.constant 0 : index
    %c0_3 = arith.constant 0 : index
    %2 = vector.load %arg3[%c0_2, %c0_3] : memref<32x4xf32, #tpu.memory_space<vmem>>, vector<32x4xf32>
    %cst = arith.constant dense<0.000000e+00> : vector<32x256xf32>
    %3 = tpu.matmul %2, %1, %cst {dimension_numbers = #tpu.dot_dimension_numbers<[1], [0], [0], [1], [0, 0, 1, 1], [], []>} : vector<32x4xf32>, vector<4x256xf32>, vector<32x256xf32> -> vector<32x256xf32>
    %4 = arith.index_cast %arg0 : i32 to index
    %c0_4 = arith.constant 0 : index
    %c0_5 = arith.constant 0 : index
    %5 = vector.load %arg4[%4, %c0_4, %c0_5] : memref<2x32x1xf32, #tpu.memory_space<vmem>>, vector<1x32x1xf32>
    %6 = vector.shape_cast %5 : vector<1x32x1xf32> to vector<32x1xf32>
    %7 = vector.broadcast %6 : vector<32x1xf32> to vector<32x256xf32>
    %8 = arith.addf %3, %7 : vector<32x256xf32>
    %cst_6 = arith.constant 5.000000e-01 : f32
    %9 = vector.broadcast %cst_6 : f32 to vector<32x256xf32>
    %10 = arith.mulf %9, %8 : vector<32x256xf32>
    %cst_7 = arith.constant 0.707106769 : f32
    %11 = vector.broadcast %cst_7 : f32 to vector<32x256xf32>
    %12 = arith.mulf %8, %11 : vector<32x256xf32>
    %13 = math.erf %12 : vector<32x256xf32>
    %cst_8 = arith.constant 1.000000e+00 : f32
    %14 = vector.broadcast %cst_8 : f32 to vector<32x256xf32>
    %15 = arith.addf %14, %13 : vector<32x256xf32>
    %16 = arith.mulf %10, %15 : vector<32x256xf32>
    %c0_9 = arith.constant 0 : index
    %c0_10 = arith.constant 0 : index
    %c0_11 = arith.constant 0 : index
    %17 = vector.load %arg5[%c0_9, %c0_10, %c0_11] : memref<1x32x256xf32, #tpu.memory_space<vmem>>, vector<1x32x256xf32>
    %18 = vector.shape_cast %17 : vector<1x32x256xf32> to vector<32x256xf32>
    %19 = vector.shape_cast %16 : vector<32x256xf32> to vector<1x32x256xf32>
    tpu.vector_store %arg5[%c0_9, %c0_10, %c0_11], %19 {strides = array<i32>} : memref<1x32x256xf32, #tpu.memory_space<vmem>>, vector<1x32x256xf32>,
    return
  }
  func.func @transform_0(%arg0: i32, %arg1: i32) -> (i32, i32, i32) {
    %c0_i32 = arith.constant 0 : i32
    %c0_i32_0 = arith.constant 0 : i32
    return %arg0, %c0_i32, %arg1 : i32, i32, i32
  }
  func.func @transform_1(%arg0: i32, %arg1: i32) -> (i32, i32) {
    %c0_i32 = arith.constant 0 : i32
    %c0_i32_0 = arith.constant 0 : i32
    %c0_i32_1 = arith.constant 0 : i32
    return %c0_i32, %c0_i32_0 : i32, i32
  }
  func.func @transform_2(%arg0: i32, %arg1: i32) -> (i32, i32, i32) {
    %c0_i32 = arith.constant 0 : i32
    %c0_i32_0 = arith.constant 0 : i32
    %c0_i32_1 = arith.constant 0 : i32
    %c0_i32_2 = arith.constant 0 : i32
    return %c0_i32, %c0_i32_0, %c0_i32_1 : i32, i32, i32
  }
  func.func @transform_3(%arg0: i32, %arg1: i32) -> (i32, i32, i32) {
    %c0_i32 = arith.constant 0 : i32
    %c0_i32_0 = arith.constant 0 : i32
    return %arg0, %c0_i32, %arg1 : i32, i32, i32
  }
}

</mosaic_0001>

<bundles_post_ra>
// kernel: tpu_custom_call.1
= control target key start
LH: loop header
LB: loop body
LE: loop exit
PB: predicated region body
PF: predicated region fallthrough
CT: control target
= control target key end

     0   :  { %8 = vsyncpa [#allocation3], 0  ;;  %s831_s0 = inlined_call_operand.vmem [shape: f32[2,4,256], index: 0, kind: input, shape index: {}]   ;;  %s832_s1 = inlined_call_operand.vmem [shape: f32[32,4], index: 1, kind: input, shape index: {}]   ;;  %s833_s2 = inlined_call_operand.vmem [shape: f32[2,32,1], index: 2, kind: input, shape index: {}]   ;;  %s834_s3 = inlined_call_operand.hbm [shape: f32[2,32,256], index: 3, kind: output, shape index: {}]  }
   0x1   :  { %10 = vsyncpa [#allocation3 + $0x1], 0  ;;  %s692_s12 = smov 0   ;;  %s694_s13 = smov 0  }
   0x2   :  { %s696_s14 = smov 0   ;;  %s698_s15 = smov 0  }
   0x3   :  { %s700_s16 = smov 0   ;;  %s702_s17 = smov 0  }
   0x4 LB: > { %s485_s18 = sadd.s32 4294967295, %s665_s17   ;;  %s486_s19 = sadd.s32 4294967294, %s665_s17   ;;  %s665_s17 = sphi %s702_s17, %s16_s17   ;;  %s661_s16 = sphi %s700_s16, %s841_s16   ;;  %s657_s15 = sphi %s698_s15, %s840_s15   ;;  %s653_s14 = sphi %s696_s14, %s839_s14   ;;  %s649_s13 = sphi %s694_s13, %s838_s13   ;;  %s645_s12 = sphi %s692_s12, %s837_s12  }
   0x5   : > { %s28_s20 = sadd.s32 1, %s661_s16  ;;  %s107_s21 = sadd.s32 1, %s653_s14 }
   0x6   : > { %p30_p0 = scmp.ge.s32.totalorder %s28_s20, 2  ;;  %p117_p1 = scmp.ne.s32.totalorder %s653_s14, %s649_s13 }
   0x7   : > { %p118_p2 = scmp.eq.s32.totalorder %s485_s18, 1  ;;  %p123_p3 = scmp.ne.s32.totalorder %s649_s13, %s645_s12 }
   0x8   : > { %s843_s20 = smov (%p30_p0, %s28_s20), 0  ;;  %p124_p5 = scmp.eq.s32.totalorder %s486_s19, 1 }
   0x9   : > { %p732_p4 = por %p118_p2, %p117_p1  ;;  %s102_s23 = ssub.s32 %s661_s16, %s843_s20 }
   0xa   : > { %p489_p6 = scmp.ge.s32.totalorder %s665_s17, 1  ;;  %p105_p7 = scmp.eq.s32.totalorder %s102_s23, 0 }
   0xb   : > { %p739_p8 = por %p124_p5, %p123_p3  ;;  %p161_p9 = scmp.lt.s32.totalorder %s665_s17, 3 }
   0xc   : > { %s745_s25 = scalar_select %p105_p7, %s653_s14, %s107_s21  }
   0xd   : > { %p162_p10 = pnand %p489_p6, %p161_p9 }
   0xe   : > { %p190_p11 = scmp.lt.s32.totalorder (!%p162_p10), %s657_s15, 1  ;;  %v667_v0 = vmov (!%p162_p10), 0.0   ;;  %s493_s26 = sshll.u32 (!%p162_p10), %s657_s15, 5  ;;  %v668_v1 = vmov (!%p162_p10), 0   ;;  %vm246_vm0 = vcmask (!%p162_p10), 1043456   ;;  %v201_v6 = vld [vmem:[%s832_s1] sm:$0xff] (!%p162_p10) }
   0xf   : > { %165 = sbr.rel (%p162_p10) target bundleno = 284 (0x11c), region = 32  ;;  %315 = vmatprep.mubr.f32.mxu0 (!%p162_p10), %v667_v0  ;;  %327 = vmatprep.mubr.f32.mxu1 (!%p162_p10), %v667_v0  ;;  %s206_s30 = scalar_lea.vmem (!%p162_p10), %s833_s2, %s493_s26  ;;  %vm233_vm1 = vcmask (!%p162_p10), 31744   ;;  %v203_v7 = vld [vmem:[%s832_s1 + $0x10] sm:$0xff] (!%p162_p10)  ;;  %v202_v10 = vld [vmem:[%s832_s1 + $0x8] sm:$0xff] (!%p162_p10)  ;;  %v204_v11 = vld [vmem:[%s832_s1 + $0x18] sm:$0xff] (!%p162_p10) }
  0x10   : > { %569 = vset.pattern.permute.xlu1 (!%p162_p10), %v668_v1  ;;  %568 = vset.pattern.permute.xlu0 (!%p162_p10), %v668_v1  ;;  %v209_v2 = vld [vmem:[%s206_s30 + $0x10] sm:$0xff] (!%p162_p10)  ;;  %v207_v3 = vld [vmem:[%s206_s30] sm:$0xff] (!%p162_p10)  ;;  %v210_v8 = vld [vmem:[%s206_s30 + $0x18] sm:$0xff] (!%p162_p10)  ;;  %s186_s26 = sand.u32 (!%p162_p10), 1, %s649_s13   ;;  %s506_s29 = sshll.u32 (!%p162_p10), %s657_s15, 10 }
  0x11   : > { %223 = vperm.xlu1 (!%p162_p10), %569, %v209_v2   ;;  %213 = vperm.xlu0 (!%p162_p10), %568, %v207_v3   ;;  %v208_v9 = vld [vmem:[%s206_s30 + $0x8] sm:$0xff] (!%p162_p10)  ;;  %s779_s6 = scalar_lea.hbm (!%p162_p10), %s834_s3, %s506_s29  ;;  %s669_s8 = smov (!%p162_p10), [#allocation2]  }
  0x12   : > { %s591_s9 = sshll.u32 (!%p162_p10), %s669_s8, 4  ;;  %s592_s9 = int_to_ptr.vmem [resolvable:$false] %s591_s9 }
  0x13   : > { %s593_s10 = scalar_lea.vmem (!%p162_p10), %s592_s9, 2048 }
  0x15   : > { %228 = vperm.xlu1 (!%p162_p10), %569, %v210_v8   ;;  %218 = vperm.xlu0 (!%p162_p10), %568, %v208_v9  }
  0x16   : > { %s191_s27 = scalar_select %p190_p11, %s657_s15, 1 }
  0x17   : > { %s785_s15 = scalar_lea.sflag [#allocation3], %s186_s26 }
  0x18   : > { %s505_s4 = sshll.u32 %s191_s27, 3  ;;  %s490_s27 = sshll.u32 %s186_s26, 6 }
  0x19   : > { %s197_s7 = scalar_lea.vmem %s831_s0, %s505_s4  ;;  %s188_s28 = scalar_lea.vmem [#allocation2], %s490_s27 }
  0x1a   : > { %v200_v4 = vld [vmem:[%s197_s7] sm:$0xff]  ;;  %s404_s30 = sshll.u32 %s188_s28, 4  ;;  %s781_s30 = int_to_ptr.vmem [resolvable:$true] %s404_s30 }
  0x1b   : > { %v232_v5 = vcombine.high %v200_v4, %v200_v4  ;;  %s587_s7 = scalar_lea.vmem %s781_s30, 1024  ;;  %p594_p1 = scmp.lt.s32.totalorder %s781_s30, %s592_s9 }
  0x1c   : > { %p588_p12 = scmp.ne.s32.totalorder %s781_s30, %s587_s7  ;;  %p595_p2 = scmp.lt.s32.totalorder %s593_s10, %s587_s7 }
  0x1d   : > { %494 = vmatprep.subr.msk.mxu0 %vm246_vm0, %v232_v5  ;;  %507 = vmatprep.subr.msk.mxu1 %vm246_vm0, %v232_v5 }
  0x1e   : > { %495 = vmatpush1.msk.msra.mxu0 %vm246_vm0, %v200_v4  ;;  %508 = vmatpush1.msk.msra.mxu1 %vm246_vm0, %v200_v4  ;;  %p589_p13 = pnand %p588_p12, %p732_p4  ;;  %p596_p3 = por %p595_p2, %p594_p1 }
  0x1f   : > { %496 = vmatmul.mubr.msk.f32.vlgmr.msra.gmra.mrb[0].mxu0 %vm233_vm1, %v201_v6  ;;  %498 = vmatmul.mubr.msk.f32.vlgmr.msra.gmra.mrb[0].mxu1 %vm233_vm1, %v203_v7 }
  0x20   : > { %321 = vmatprep.mubr.f32.mxu0 %v667_v0  ;;  %333 = vmatprep.mubr.f32.mxu1 %v667_v0  ;;  %p590_p0 = pneg %p589_p13 }
  0x22   : > { %p597_p5 = pnand %p596_p3, %p590_p0 }
  0x23   : > { %497 = vmatmul.mubr.msk.f32.gmra.mrb[2].mxu0 %vm233_vm1, %v202_v10  ;;  %499 = vmatmul.mubr.msk.f32.gmra.mrb[2].mxu1 %vm233_vm1, %v204_v11 }
  0x90   : > { %v224_v12 = vpop.permute.xlu1 %223  ;;  %v214_v13 = vpop.permute.xlu0 %213 }
  0x94   : > { %v229_v24 = vpop.permute.xlu1 %228  ;;  %v219_v25 = vpop.permute.xlu0 %218 }
  0xf2   : > { %v317_v14 = vpop.f32.mrb[0].mxu0  ;;  %v329_v15 = vpop.f32.mrb[0].mxu1 }
  0xf3   : > { %v318_v16 = vadd.f32 %v317_v14, %v214_v13  ;;  %v330_v17 = vadd.f32 %v329_v15, %v224_v12  ;;  %v319_v18 = vpop.f32.mrb[1].mxu0  ;;  %v331_v19 = vpop.f32.mrb[1].mxu1 }
  0xf4   : > { %v320_v20 = vadd.f32 %v319_v18, %v214_v13  ;;  %v332_v21 = vadd.f32 %v331_v19, %v224_v12 }
  0xf5   : > { %v348_v22 = vmul.f32 0.70710677, %v318_v16  ;;  %v352_v23 = vmul.f32 0.70710677, %v330_v17  ;;  %v340_v42 = vmul.f32 0.5, %v318_v16  ;;  %v344_v45 = vmul.f32 0.5, %v330_v17 }
  0xf6   : > { %v349_v26 = vmul.f32 0.70710677, %v320_v20  ;;  %v353_v27 = vmul.f32 0.70710677, %v332_v21  ;;  %v323_v28 = vpop.f32.mrb[2].mxu0  ;;  %v335_v29 = vpop.f32.mrb[2].mxu1 }
  0xf7   : > { %571 = verf.f32 %v348_v22  ;;  %v324_v30 = vadd.f32 %v323_v28, %v219_v25  ;;  %v336_v31 = vadd.f32 %v335_v29, %v229_v24  ;;  %v325_v32 = vpop.f32.mrb[3].mxu0  ;;  %v337_v33 = vpop.f32.mrb[3].mxu1  ;;  %v341_v49 = vmul.f32 0.5, %v320_v20 }
  0xf8   : > { %573 = verf.f32 %v352_v23  ;;  %v326_v34 = vadd.f32 %v325_v32, %v219_v25  ;;  %v338_v35 = vadd.f32 %v337_v33, %v229_v24  ;;  %v345_v52 = vmul.f32 0.5, %v332_v21 }
  0xf9   : > { %575 = verf.f32 %v349_v26  ;;  %v350_v36 = vmul.f32 0.70710677, %v324_v30  ;;  %v354_v37 = vmul.f32 0.70710677, %v336_v31  ;;  %v342_v58 = vmul.f32 0.5, %v324_v30 }
  0xfa   : > { %577 = verf.f32 %v353_v27  ;;  %v351_v38 = vmul.f32 0.70710677, %v326_v34  ;;  %v355_v39 = vmul.f32 0.70710677, %v338_v35  ;;  %v346_v61 = vmul.f32 0.5, %v336_v31 }
  0xfb   : > { %579 = verf.f32 %v350_v36  ;;  %v343_v1 = vmul.f32 0.5, %v326_v34  ;;  %v347_v4 = vmul.f32 0.5, %v338_v35 }
  0xfc   : > { %581 = verf.f32 %v354_v37 }
  0xfd   : > { %583 = verf.f32 %v351_v38 }
  0xfe   : > { %585 = verf.f32 %v355_v39 }
 0x101   : > { %v572_v40 = vpop.eup %571 }
 0x102   : > { %v574_v41 = vpop.eup %573  ;;  %v364_v43 = vadd.f32 1.0, %v572_v40 }
 0x103   : > { %v576_v44 = vpop.eup %575  ;;  %v368_v46 = vadd.f32 1.0, %v574_v41 }
 0x104   : > { %v578_v47 = vpop.eup %577  ;;  %v372_v48 = vmul.f32 %v364_v43, %v340_v42  ;;  %v365_v50 = vadd.f32 1.0, %v576_v44 }
 0x105   : > { %v376_v51 = vmul.f32 %v368_v46, %v344_v45  ;;  %v369_v53 = vadd.f32 1.0, %v578_v47  ;;  %v580_v54 = vpop.eup %579 }
 0x106   : > { %380 = vst [vmem:[%s188_s28] sm:$0xff] %v372_v48  ;;  %v373_v55 = vmul.f32 %v365_v50, %v341_v49  ;;  %v582_v56 = vpop.eup %581  ;;  %v366_v59 = vadd.f32 1.0, %v580_v54 }
 0x107   : > { %384 = vst [vmem:[%s188_s28 + $0x20] sm:$0xff] %v376_v51  ;;  %v377_v57 = vmul.f32 %v369_v53, %v345_v52  ;;  %v584_v60 = vpop.eup %583  ;;  %v370_v62 = vadd.f32 1.0, %v582_v56 }
 0x108   : > { %381 = vst [vmem:[%s188_s28 + $0x8] sm:$0xff] %v373_v55  ;;  %v586_v63 = vpop.eup %585  ;;  %v374_v0 = vmul.f32 %v366_v59, %v342_v58  ;;  %v367_v2 = vadd.f32 1.0, %v584_v60 }
 0x109   : > { %385 = vst [vmem:[%s188_s28 + $0x28] sm:$0xff] %v377_v57  ;;  %v378_v3 = vmul.f32 %v370_v62, %v346_v61  ;;  %v371_v5 = vadd.f32 1.0, %v586_v63 }
 0x10a   : > { %382 = vst [vmem:[%s188_s28 + $0x10] sm:$0xff] %v374_v0  ;;  %v375_v6 = vmul.f32 %v367_v2, %v343_v1 }
 0x10b   : > { %386 = vst [vmem:[%s188_s28 + $0x30] sm:$0xff] %v378_v3  ;;  %v379_v7 = vmul.f32 %v371_v5, %v347_v4 }
 0x10c   : > { %383 = vst [vmem:[%s188_s28 + $0x18] sm:$0xff] %v375_v6 }
 0x10d   : > { %387 = vst [vmem:[%s188_s28 + $0x38] sm:$0xff] %v379_v7 }
 0x10e   : > { %600 = shalt.err (!%p597_p5)
}
 0x10f   : > { %s601_s11 = scalar_lea.hbm %s779_s6, 1024  ;;  %s605_s21 = scalar_lea.hbm %s834_s3, 2048 }
 0x110   : > { %p602_p6 = scmp.ne.s32.totalorder %s779_s6, %s601_s11  ;;  %p606_p10 = scmp.lt.u32.totalorder %s779_s6, %s834_s3 }
 0x111   : > { %p607_p11 = scmp.lt.u32.totalorder %s605_s21, %s601_s11  ;;  %p609_p13 = scmp.lt.u32.totalorder %s601_s11, %s779_s6 }
 0x112   : > { %p603_p7 = pnand %p602_p6, %p732_p4 }
 0x113   : > { %p608_p12 = por %p607_p11, %p606_p10 }
 0x114   : > { %p604_p9 = pneg %p603_p7 }
 0x115   : > { %p610_p0 = por %p609_p13, %p608_p12 }
 0x117   : > { %p611_p1 = pnand %p610_p0, %p604_p9 }
 0x119   : > { %614 = shalt.err (!%p611_p1)
}
 0x11a   : > { %s670_s27 = smov 256   ;;  %s671_s28 = smov 16  }
 0x11b   : > { %509 = dma.vmem_to_hbm [thread:$0]  (%p732_p4), %s781_s30, 1024, %s779_s6, %s785_s15, %s670_s27, %s670_s27, %s671_s28  }
 0x11c PF: > { %p515_p2 = scmp.ge.s32.totalorder %s665_s17, 2  ;;  %s419_s29 = sand.u32 1, %s645_s12  }
 0x11d   : > { %s420_s4 = scalar_lea.sflag [#allocation3], %s419_s29 }
 0x11e   : > { %p512_p3 = pnand %p515_p2, %p739_p8 }
 0x120   : > { %640 = dma.done.wait (!%p512_p3), %s420_s4, 1024  }
 0x121   : > { %642 = vsyncadd (!%p512_p3), %s420_s4, 4294966272  ;;  %s16_s17 = sadd.s32 1, %s665_s17   ;;  %s837_s12 = smov %s649_s13 }
 0x122   : > { %p13_p5 = scmp.ge.s32.totalorder %s16_s17, 4   ;;  %s838_s13 = smov %s653_s14 }
 0x123   : > { %s839_s14 = smov %s745_s25  ;;  %s840_s15 = smov %s661_s16 }
 0x124   : > { %s841_s16 = smov %s843_s20  ;;  %15 = sbr.rel (!%p13_p5) target bundleno = 4 (0x4), region = 68 }
 0x12b   :  { %425 = vsyncpa [#allocation3], 1 }
 0x12c   :  { %427 = vsyncpa [#allocation3 + $0x1], 1 }

</bundles_post_ra>
